<compile_context>
chip_gen: v5e
topology: v5e:2x2
jax: 0.10.0
libtpu: 0.0.40
codegen_flags: <defaults>
</compile_context>

<pallas_src>
import functools

import jax
import jax.numpy as jnp
import numpy as np
from jax.experimental import pallas as pl
from jax.experimental.pallas import tpu as pltpu


def _batch_renorm_kernel(x_ref, rmean_ref, rvar_ref, w_ref, b_ref,
                         y_ref, r_ref, d_ref, meanc_ref, uvarc_ref,
                         mean_acc, uvar_acc,
                         *, eps, rmax, dmax, hw_total):
    c = pl.program_id(0)
    t = pl.program_id(1)
    num_t = pl.num_programs(1)

    x = x_ref[...].astype(jnp.float32)                    # (N, tile_hw)
    n = x.shape[0]

    mean = jnp.mean(x, axis=0, keepdims=True)             # (1, tile_hw)
    diff = x - mean                                       # (N, tile_hw)
    ssq = jnp.sum(diff * diff, axis=0, keepdims=True)     # (1, tile_hw)

    invstd = jax.lax.rsqrt(ssq * (1.0 / n) + eps)         # EUP rsqrt
    uvar = ssq * (1.0 / (n - 1))                          # unbiased variance

    run_mean = rmean_ref[c]                                # scalars from SMEM
    run_var = rvar_ref[c]
    w = w_ref[c]
    b = b_ref[c]

    # reciprocal-sqrt of running_var, multiplied in (no per-lane divides).
    inv_srv = jax.lax.rsqrt(jnp.full_like(mean, run_var))  # (1, tile_hw)

    r = jnp.clip(jnp.sqrt(uvar) * inv_srv, 1.0 / rmax, rmax)     # (1, tile_hw)
    d = jnp.clip((mean - run_mean) * inv_srv, -dmax, dmax)       # (1, tile_hw)

    # Folded affine: 1 mul + 1 add per (N, tile_hw) element.
    scale = invstd * r * w                                 # (1, tile_hw)
    offset = d * w + b                                     # (1, tile_hw)

    y_ref[...] = (diff * scale + offset).astype(y_ref.dtype)
    r_ref[...] = r
    d_ref[...] = d

    # Per-channel HW reduction of mean/uvar for the running-stat update.
    @pl.when(t == 0)
    def _():
        mean_acc[...] = jnp.zeros_like(mean_acc)
        uvar_acc[...] = jnp.zeros_like(uvar_acc)

    mean_acc[...] += mean
    uvar_acc[...] += uvar

    @pl.when(t == num_t - 1)
    def _():
        inv_hw = 1.0 / hw_total
        m = jnp.sum(mean_acc[...], axis=1, keepdims=True) * inv_hw   # (1, 1)
        v = jnp.sum(uvar_acc[...], axis=1, keepdims=True) * inv_hw   # (1, 1)
        meanc_ref[...] = jnp.broadcast_to(m, meanc_ref.shape)
        uvarc_ref[...] = jnp.broadcast_to(v, uvarc_ref.shape)


def _choose_tile_hw(hw, n):
    """Largest multiple-of-128 divisor of hw, capped so the x/y blocks
    (double-buffered) stay well inside a v7x-safe 32 MiB scoped-VMEM budget."""
    budget_bytes = 2 * 1024 * 1024                 # per x block
    row_bytes = 4 * max(n, 8)                      # f32, sublane-padded rows
    cap = max(128, min(8192, (budget_bytes // row_bytes) // 128 * 128))
    best = 128
    t = 128
    while t <= min(hw, cap):
        if hw % t == 0:
            best = t
        t += 128
    return best


def batch_renorm2d_train(x, running_mean, running_var, weight=None, bias=None,
                         eps=1e-5, momentum=0.1, rmax=3.0, dmax=5.0):
    """Training-mode forward. x: (N, C, H, W).

    Returns (y, r, d, new_running_mean, new_running_var)."""
    N, C, H, W = x.shape
    HW = H * W
    assert N >= 2, "training-mode BatchReNorm needs N >= 2 (unbiased variance)"
    # TODO(synk): pad/mask the lane dimension to support spatial sizes whose
    # flattened extent is not a multiple of 128 (7x7, 14x14, ...).
    assert HW % 128 == 0, "flattened spatial dim must be a multiple of 128"

    if weight is None:            # affine=False path of the module
        weight = jnp.ones((C,), jnp.float32)
    if bias is None:
        bias = jnp.zeros((C,), jnp.float32)

    tile_hw = _choose_tile_hw(HW, N)
    num_t = HW // tile_hw

    # FREE reshape: NCHW -> (N, C*HW).  Channel c / tile t is the contiguous
    # column range [c*HW + t*tile_hw, ...) -> rectangular (N, tile_hw) block,
    # no host-side transpose needed in either direction.
    x2 = x.reshape(N, C * HW)

    kernel = functools.partial(_batch_renorm_kernel, eps=eps, rmax=rmax,
                               dmax=dmax, hw_total=float(HW))

    out_shapes = (
        jax.ShapeDtypeStruct((N, C * HW), x.dtype),        # y
        jax.ShapeDtypeStruct((1, C * HW), jnp.float32),    # r  (per position)
        jax.ShapeDtypeStruct((1, C * HW), jnp.float32),    # d  (per position)
        jax.ShapeDtypeStruct((1, C * 128), jnp.float32),   # mean_HW(mean) per ch
        jax.ShapeDtypeStruct((1, C * 128), jnp.float32),   # mean_HW(uvar) per ch
    )

    smem_spec = pl.BlockSpec(memory_space=pltpu.SMEM)
    col = lambda c, t: (0, c * num_t + t)

    y2, r2, d2, meanc, uvarc = pl.pallas_call(
        kernel,
        out_shape=out_shapes,
        grid_spec=pltpu.PrefetchScalarGridSpec(
            num_scalar_prefetch=0,
            grid=(C, num_t),
            in_specs=[
                pl.BlockSpec((N, tile_hw), col),   # x
                smem_spec,                         # running_mean (C,)
                smem_spec,                         # running_var  (C,)
                smem_spec,                         # weight       (C,)
                smem_spec,                         # bias         (C,)
            ],
            out_specs=[
                pl.BlockSpec((N, tile_hw), col),               # y
                pl.BlockSpec((1, tile_hw), col),               # r
                pl.BlockSpec((1, tile_hw), col),               # d
                pl.BlockSpec((1, 128), lambda c, t: (0, c)),   # mean per ch
                pl.BlockSpec((1, 128), lambda c, t: (0, c)),   # uvar per ch
            ],
            scratch_shapes=[
                pltpu.VMEM((1, tile_hw), jnp.float32),   # mean accumulator
                pltpu.VMEM((1, tile_hw), jnp.float32),   # uvar accumulator
            ],
        ),
        compiler_params=pltpu.CompilerParams(
            dimension_semantics=("parallel", "arbitrary"),
            vmem_limit_bytes=32 * 1024 * 1024,
        ),
    )(x2, running_mean.astype(jnp.float32), running_var.astype(jnp.float32),
      weight.astype(jnp.float32), bias.astype(jnp.float32))

    # Free reshapes back to module layouts.
    y = y2.reshape(N, C, H, W)
    r = r2.reshape(C, H, W)
    d = d2.reshape(C, H, W)
    mean_c = meanc.reshape(C, 128)[:, 0]
    uvar_c = uvarc.reshape(C, 128)[:, 0]

    # Tiny (C,)-sized running-buffer updates (exactly the PyTorch formula:
    # += mean_HW(momentum*(stat - running_stat)) == momentum*(mean_HW(stat)-running_stat)).
    new_rm = running_mean + momentum * (mean_c - running_mean)
    new_rv = running_var + momentum * (uvar_c - running_var)

    # TODO(synk): eval-mode branch (normalize with running stats only) not wired up here.
    return y, r, d, new_rm, new_rv


def _reference(x, running_mean, running_var, weight, bias,
               eps=1e-5, momentum=0.1, rmax=3.0, dmax=5.0):
    n = x.shape[0]
    mean = jnp.mean(x, axis=0)                               # (C,H,W)
    ssq = jnp.sum((x - mean[None]) ** 2, axis=0)             # (C,H,W)
    invstd = 1.0 / jnp.sqrt(ssq / n + eps)
    uvar = ssq / (n - 1)
    srv = jnp.sqrt(running_var)[:, None, None]
    r = jnp.clip(jnp.sqrt(uvar) / srv, 1.0 / rmax, rmax)
    d = jnp.clip((mean - running_mean[:, None, None]) / srv, -dmax, dmax)
    xn = (x - mean[None]) * invstd[None] * r[None] + d[None]
    y = xn * weight[None, :, None, None] + bias[None, :, None, None]
    new_rm = running_mean + jnp.mean(
        momentum * (mean - running_mean[:, None, None]), axis=(1, 2))
    new_rv = running_var + jnp.mean(
        momentum * (uvar - running_var[:, None, None]), axis=(1, 2))
    return y, r, d, new_rm, new_rv


if __name__ == "__main__":
    key = jax.random.PRNGKey(0)
    N, C, H, W = 2, 4, 16, 16

    kx, kw = jax.random.split(key)
    x = jax.random.normal(kx, (N, C, H, W), dtype=jnp.float32)

    # Deterministic parameter init mirroring the module's reset_parameters:
    weight = jax.random.uniform(kw, (C,), dtype=jnp.float32)   # weight.data.uniform_()
    bias = jnp.zeros((C,), jnp.float32)                        # bias.data.zero_()
    running_mean = jnp.zeros((C,), jnp.float32)
    running_var = jnp.ones((C,), jnp.float32)

    outs = batch_renorm2d_train(x, running_mean, running_var, weight, bias)
    outs = jax.block_until_ready(outs)
    y, r, d, new_rm, new_rv = outs

    y_ref, r_ref, d_ref, rm_ref, rv_ref = _reference(
        x, running_mean, running_var, weight, bias)

    np.testing.assert_allclose(np.asarray(y), np.asarray(y_ref), rtol=1e-4, atol=1e-4)
    np.testing.assert_allclose(np.asarray(r), np.asarray(r_ref), rtol=1e-4, atol=1e-4)
    np.testing.assert_allclose(np.asarray(d), np.asarray(d_ref), rtol=1e-4, atol=1e-4)
    np.testing.assert_allclose(np.asarray(new_rm), np.asarray(rm_ref), rtol=1e-4, atol=1e-5)
    np.testing.assert_allclose(np.asarray(new_rv), np.asarray(rv_ref), rtol=1e-4, atol=1e-5)

    print("KERNEL_OK")
</pallas_src>

<mosaic_0001>
module attributes {stable_mosaic.version = 11 : i64} {
  func.func @_batch_renorm_kernel(%arg0: i32, %arg1: i32, %arg2: memref<2x256xf32, #tpu.memory_space<vmem>>, %arg3: memref<4xf32, #tpu.memory_space<smem>>, %arg4: memref<4xf32, #tpu.memory_space<smem>>, %arg5: memref<4xf32, #tpu.memory_space<smem>>, %arg6: memref<4xf32, #tpu.memory_space<smem>>, %arg7: memref<2x256xf32, #tpu.memory_space<vmem>>, %arg8: memref<1x256xf32, #tpu.memory_space<vmem>>, %arg9: memref<1x256xf32, #tpu.memory_space<vmem>>, %arg10: memref<1x128xf32, #tpu.memory_space<vmem>>, %arg11: memref<1x128xf32, #tpu.memory_space<vmem>>, %arg12: memref<1x256xf32, #tpu.memory_space<vmem>>, %arg13: memref<1x256xf32, #tpu.memory_space<vmem>>) attributes {dimension_semantics = [#tpu.dimension_semantics<parallel>, #tpu.dimension_semantics<arbitrary>], iteration_bounds = array<i64: 4, 1>, scalar_prefetch = 0 : i64, scratch_operands = 2 : i64, tpu.core_type = #tpu.core_type<tc>, window_params = [{transform_indices = @transform_0, window_bounds = array<i64: 2, 256>}, {transform_indices = @transform_1, window_bounds = array<i64: 4>}, {transform_indices = @transform_2, window_bounds = array<i64: 4>}, {transform_indices = @transform_3, window_bounds = array<i64: 4>}, {transform_indices = @transform_4, window_bounds = array<i64: 4>}, {transform_indices = @transform_5, window_bounds = array<i64: 2, 256>}, {transform_indices = @transform_6, window_bounds = array<i64: 1, 256>}, {transform_indices = @transform_7, window_bounds = array<i64: 1, 256>}, {transform_indices = @transform_8, window_bounds = array<i64: 1, 128>}, {transform_indices = @transform_9, window_bounds = array<i64: 1, 128>}]} {
    %c0 = arith.constant 0 : index
    %c0_0 = arith.constant 0 : index
    %0 = vector.load %arg2[%c0, %c0_0] : memref<2x256xf32, #tpu.memory_space<vmem>>, vector<2x256xf32>
    %cst = arith.constant dense<0.000000e+00> : vector<256xf32>
    %1 = vector.multi_reduction <add>, %0, %cst [0] : vector<2x256xf32> to vector<256xf32>
    %2 = vector.shape_cast %1 : vector<256xf32> to vector<1x256xf32>
    %cst_1 = arith.constant 2.000000e+00 : f32
    %3 = vector.broadcast %cst_1 : f32 to vector<1x256xf32>
    %4 = arith.divf %2, %3 : vector<1x256xf32>
    %5 = vector.broadcast %4 : vector<1x256xf32> to vector<2x256xf32>
    %6 = arith.subf %0, %5 : vector<2x256xf32>
    %7 = arith.mulf %6, %6 : vector<2x256xf32>
    %cst_2 = arith.constant dense<0.000000e+00> : vector<256xf32>
    %8 = vector.multi_reduction <add>, %7, %cst_2 [0] : vector<2x256xf32> to vector<256xf32>
    %9 = vector.shape_cast %8 : vector<256xf32> to vector<1x256xf32>
    %cst_3 = arith.constant 5.000000e-01 : f32
    %10 = vector.broadcast %cst_3 : f32 to vector<1x256xf32>
    %11 = arith.mulf %9, %10 : vector<1x256xf32>
    %cst_4 = arith.constant 9.99999974E-6 : f32
    %12 = vector.broadcast %cst_4 : f32 to vector<1x256xf32>
    %13 = arith.addf %11, %12 : vector<1x256xf32>
    %14 = math.rsqrt %13 : vector<1x256xf32>
    %cst_5 = arith.constant 1.000000e+00 : f32
    %15 = vector.broadcast %cst_5 : f32 to vector<1x256xf32>
    %16 = arith.mulf %9, %15 : vector<1x256xf32>
    %17 = arith.index_cast %arg0 : i32 to index
    %18 = memref.load %arg3[%17] : memref<4xf32, #tpu.memory_space<smem>>
    %19 = arith.index_cast %arg0 : i32 to index
    %20 = memref.load %arg4[%19] : memref<4xf32, #tpu.memory_space<smem>>
    %21 = arith.index_cast %arg0 : i32 to index
    %22 = memref.load %arg5[%21] : memref<4xf32, #tpu.memory_space<smem>>
    %23 = arith.index_cast %arg0 : i32 to index
    %24 = memref.load %arg6[%23] : memref<4xf32, #tpu.memory_space<smem>>
    %25 = vector.broadcast %20 : f32 to vector<1x256xf32>
    %26 = math.rsqrt %25 : vector<1x256xf32>
    %27 = math.sqrt %16 : vector<1x256xf32>
    %28 = arith.mulf %27, %26 : vector<1x256xf32>
    %cst_6 = arith.constant 0.333333343 : f32
    %cst_7 = arith.constant 3.000000e+00 : f32
    %29 = vector.broadcast %cst_6 : f32 to vector<1x256xf32>
    %30 = arith.maximumf %29, %28 : vector<1x256xf32>
    %31 = vector.broadcast %cst_7 : f32 to vector<1x256xf32>
    %32 = arith.minimumf %31, %30 : vector<1x256xf32>
    %33 = vector.broadcast %18 : f32 to vector<1x256xf32>
    %34 = arith.subf %4, %33 : vector<1x256xf32>
    %35 = arith.mulf %34, %26 : vector<1x256xf32>
    %cst_8 = arith.constant -5.000000e+00 : f32
    %cst_9 = arith.constant 5.000000e+00 : f32
    %36 = vector.broadcast %cst_8 : f32 to vector<1x256xf32>
    %37 = arith.maximumf %36, %35 : vector<1x256xf32>
    %38 = vector.broadcast %cst_9 : f32 to vector<1x256xf32>
    %39 = arith.minimumf %38, %37 : vector<1x256xf32>
    %40 = arith.mulf %14, %32 : vector<1x256xf32>
    %41 = vector.broadcast %22 : f32 to vector<1x256xf32>
    %42 = arith.mulf %40, %41 : vector<1x256xf32>
    %43 = vector.broadcast %22 : f32 to vector<1x256xf32>
    %44 = arith.mulf %39, %43 : vector<1x256xf32>
    %45 = vector.broadcast %24 : f32 to vector<1x256xf32>
    %46 = arith.addf %44, %45 : vector<1x256xf32>
    %47 = vector.broadcast %42 : vector<1x256xf32> to vector<2x256xf32>
    %48 = arith.mulf %6, %47 : vector<2x256xf32>
    %49 = vector.broadcast %46 : vector<1x256xf32> to vector<2x256xf32>
    %50 = arith.addf %48, %49 : vector<2x256xf32>
    %c0_10 = arith.constant 0 : index
    %c0_11 = arith.constant 0 : index
    %51 = vector.load %arg7[%c0_10, %c0_11] : memref<2x256xf32, #tpu.memory_space<vmem>>, vector<2x256xf32>
    tpu.vector_store %arg7[%c0_10, %c0_11], %50 {strides = array<i32>} : memref<2x256xf32, #tpu.memory_space<vmem>>, vector<2x256xf32>,
    %c0_12 = arith.constant 0 : index
    %c0_13 = arith.constant 0 : index
    %52 = vector.load %arg8[%c0_12, %c0_13] : memref<1x256xf32, #tpu.memory_space<vmem>>, vector<1x256xf32>
    tpu.vector_store %arg8[%c0_12, %c0_13], %32 {strides = array<i32>} : memref<1x256xf32, #tpu.memory_space<vmem>>, vector<1x256xf32>,
    %c0_14 = arith.constant 0 : index
    %c0_15 = arith.constant 0 : index
    %53 = vector.load %arg9[%c0_14, %c0_15] : memref<1x256xf32, #tpu.memory_space<vmem>>, vector<1x256xf32>
    tpu.vector_store %arg9[%c0_14, %c0_15], %39 {strides = array<i32>} : memref<1x256xf32, #tpu.memory_space<vmem>>, vector<1x256xf32>,
    %c0_i32 = arith.constant 0 : i32
    %54 = arith.cmpi eq, %arg1, %c0_i32 : i32
    %55 = arith.extui %54 : i1 to i32
    %c0_i32_16 = arith.constant 0 : i32
    %56 = arith.cmpi ne, %55, %c0_i32_16 : i32
    scf.if %56 {
      %cst_27 = arith.constant 0.000000e+00 : f32
      %66 = vector.broadcast %cst_27 : f32 to vector<1x256xf32>
      %c0_28 = arith.constant 0 : index
      %c0_29 = arith.constant 0 : index
      %67 = vector.load %arg12[%c0_28, %c0_29] : memref<1x256xf32, #tpu.memory_space<vmem>>, vector<1x256xf32>
      tpu.vector_store %arg12[%c0_28, %c0_29], %66 {strides = array<i32>} : memref<1x256xf32, #tpu.memory_space<vmem>>, vector<1x256xf32>,
      %cst_30 = arith.constant 0.000000e+00 : f32
      %68 = vector.broadcast %cst_30 : f32 to vector<1x256xf32>
      %c0_31 = arith.constant 0 : index
      %c0_32 = arith.constant 0 : index
      %69 = vector.load %arg13[%c0_31, %c0_32] : memref<1x256xf32, #tpu.memory_space<vmem>>, vector<1x256xf32>
      tpu.vector_store %arg13[%c0_31, %c0_32], %68 {strides = array<i32>} : memref<1x256xf32, #tpu.memory_space<vmem>>, vector<1x256xf32>,
    } else {
    }
    %c0_17 = arith.constant 0 : index
    %c0_18 = arith.constant 0 : index
    %57 = vector.load %arg12[%c0_17, %c0_18] : memref<1x256xf32, #tpu.memory_space<vmem>>, vector<1x256xf32>
    %58 = arith.addf %57, %4 : vector<1x256xf32>
    %c0_19 = arith.constant 0 : index
    %c0_20 = arith.constant 0 : index
    %59 = vector.load %arg12[%c0_19, %c0_20] : memref<1x256xf32, #tpu.memory_space<vmem>>, vector<1x256xf32>
    tpu.vector_store %arg12[%c0_19, %c0_20], %58 {strides = array<i32>} : memref<1x256xf32, #tpu.memory_space<vmem>>, vector<1x256xf32>,
    %c0_21 = arith.constant 0 : index
    %c0_22 = arith.constant 0 : index
    %60 = vector.load %arg13[%c0_21, %c0_22] : memref<1x256xf32, #tpu.memory_space<vmem>>, vector<1x256xf32>
    %61 = arith.addf %60, %16 : vector<1x256xf32>
    %c0_23 = arith.constant 0 : index
    %c0_24 = arith.constant 0 : index
    %62 = vector.load %arg13[%c0_23, %c0_24] : memref<1x256xf32, #tpu.memory_space<vmem>>, vector<1x256xf32>
    tpu.vector_store %arg13[%c0_23, %c0_24], %61 {strides = array<i32>} : memref<1x256xf32, #tpu.memory_space<vmem>>, vector<1x256xf32>,
    %c0_i32_25 = arith.constant 0 : i32
    %63 = arith.cmpi eq, %arg1, %c0_i32_25 : i32
    %64 = arith.extui %63 : i1 to i32
    %c0_i32_26 = arith.constant 0 : i32
    %65 = arith.cmpi ne, %64, %c0_i32_26 : i32
    scf.if %65 {
      %c0_27 = arith.constant 0 : index
      %c0_28 = arith.constant 0 : index
      %66 = vector.load %arg12[%c0_27, %c0_28] : memref<1x256xf32, #tpu.memory_space<vmem>>, vector<1x256xf32>
      %cst_29 = arith.constant dense<0.000000e+00> : vector<1xf32>
      %67 = vector.multi_reduction <add>, %66, %cst_29 [1] : vector<1x256xf32> to vector<1xf32>
      %68 = vector.shape_cast %67 : vector<1xf32> to vector<1x1xf32>
      %cst_30 = arith.constant 3.906250e-03 : f32
      %69 = vector.broadcast %cst_30 : f32 to vector<1x1xf32>
      %70 = arith.mulf %68, %69 : vector<1x1xf32>
      %c0_31 = arith.constant 0 : index
      %c0_32 = arith.constant 0 : index
      %71 = vector.load %arg13[%c0_31, %c0_32] : memref<1x256xf32, #tpu.memory_space<vmem>>, vector<1x256xf32>
      %cst_33 = arith.constant dense<0.000000e+00> : vector<1xf32>
      %72 = vector.multi_reduction <add>, %71, %cst_33 [1] : vector<1x256xf32> to vector<1xf32>
      %73 = vector.shape_cast %72 : vector<1xf32> to vector<1x1xf32>
      %cst_34 = arith.constant 3.906250e-03 : f32
      %74 = vector.broadcast %cst_34 : f32 to vector<1x1xf32>
      %75 = arith.mulf %73, %74 : vector<1x1xf32>
      %76 = vector.shape_cast %70 : vector<1x1xf32> to vector<1x1xf32>
      %77 = vector.broadcast %76 : vector<1x1xf32> to vector<1x128xf32>
      %c0_35 = arith.constant 0 : index
      %c0_36 = arith.constant 0 : index
      %78 = vector.load %arg10[%c0_35, %c0_36] : memref<1x128xf32, #tpu.memory_space<vmem>>, vector<1x128xf32>
      tpu.vector_store %arg10[%c0_35, %c0_36], %77 {strides = array<i32>} : memref<1x128xf32, #tpu.memory_space<vmem>>, vector<1x128xf32>,
      %79 = vector.shape_cast %75 : vector<1x1xf32> to vector<1x1xf32>
      %80 = vector.broadcast %79 : vector<1x1xf32> to vector<1x128xf32>
      %c0_37 = arith.constant 0 : index
      %c0_38 = arith.constant 0 : index
      %81 = vector.load %arg11[%c0_37, %c0_38] : memref<1x128xf32, #tpu.memory_space<vmem>>, vector<1x128xf32>
      tpu.vector_store %arg11[%c0_37, %c0_38], %80 {strides = array<i32>} : memref<1x128xf32, #tpu.memory_space<vmem>>, vector<1x128xf32>,
    } else {
    }
    return
  }
  func.func @transform_0(%arg0: i32, %arg1: i32) -> (i32, i32) {
    %c1_i32 = arith.constant 1 : i32
    %0 = arith.muli %arg0, %c1_i32 : i32
    %1 = arith.addi %0, %arg1 : i32
    %c0_i32 = arith.constant 0 : i32
    %c0_i32_0 = arith.constant 0 : i32
    return %c0_i32, %1 : i32, i32
  }
  func.func @transform_1(%arg0: i32, %arg1: i32) -> i32 {
    %c0_i32 = arith.constant 0 : i32
    %c0_i32_0 = arith.constant 0 : i32
    return %c0_i32 : i32
  }
  func.func @transform_2(%arg0: i32, %arg1: i32) -> i32 {
    %c0_i32 = arith.constant 0 : i32
    %c0_i32_0 = arith.constant 0 : i32
    return %c0_i32 : i32
  }
  func.func @transform_3(%arg0: i32, %arg1: i32) -> i32 {
    %c0_i32 = arith.constant 0 : i32
    %c0_i32_0 = arith.constant 0 : i32
    return %c0_i32 : i32
  }
  func.func @transform_4(%arg0: i32, %arg1: i32) -> i32 {
    %c0_i32 = arith.constant 0 : i32
    %c0_i32_0 = arith.constant 0 : i32
    return %c0_i32 : i32
  }
  func.func @transform_5(%arg0: i32, %arg1: i32) -> (i32, i32) {
    %c1_i32 = arith.constant 1 : i32
    %0 = arith.muli %arg0, %c1_i32 : i32
    %1 = arith.addi %0, %arg1 : i32
    %c0_i32 = arith.constant 0 : i32
    %c0_i32_0 = arith.constant 0 : i32
    return %c0_i32, %1 : i32, i32
  }
  func.func @transform_6(%arg0: i32, %arg1: i32) -> (i32, i32) {
    %c1_i32 = arith.constant 1 : i32
    %0 = arith.muli %arg0, %c1_i32 : i32
    %1 = arith.addi %0, %arg1 : i32
    %c0_i32 = arith.constant 0 : i32
    %c0_i32_0 = arith.constant 0 : i32
    return %c0_i32, %1 : i32, i32
  }
  func.func @transform_7(%arg0: i32, %arg1: i32) -> (i32, i32) {
    %c1_i32 = arith.constant 1 : i32
    %0 = arith.muli %arg0, %c1_i32 : i32
    %1 = arith.addi %0, %arg1 : i32
    %c0_i32 = arith.constant 0 : i32
    %c0_i32_0 = arith.constant 0 : i32
    return %c0_i32, %1 : i32, i32
  }
  func.func @transform_8(%arg0: i32, %arg1: i32) -> (i32, i32) {
    %c0_i32 = arith.constant 0 : i32
    %c0_i32_0 = arith.constant 0 : i32
    return %c0_i32, %arg0 : i32, i32
  }
  func.func @transform_9(%arg0: i32, %arg1: i32) -> (i32, i32) {
    %c0_i32 = arith.constant 0 : i32
    %c0_i32_0 = arith.constant 0 : i32
    return %c0_i32, %arg0 : i32, i32
  }
}

</mosaic_0001>

<bundles_post_ra>
// kernel: tpu_custom_call.1
= control target key start
LH: loop header
LB: loop body
LE: loop exit
PB: predicated region body
PF: predicated region fallthrough
CT: control target
= control target key end

     0   :  { %s1945_s0 = inlined_call_operand.hbm [shape: f32[2,1024], index: 0, kind: input, shape index: {}]   ;;  %s1946_s1 = inlined_call_operand.hbm [shape: f32[4], index: 1, kind: input, shape index: {}]   ;;  %s1947_s2 = inlined_call_operand.vmem [shape: f32[4], index: 2, kind: input, shape index: {}]   ;;  %s1948_s3 = inlined_call_operand.vmem [shape: f32[4], index: 3, kind: input, shape index: {}]   ;;  %s1949_s4 = inlined_call_operand.vmem [shape: f32[4], index: 4, kind: input, shape index: {}]   ;;  %s1950_s5 = inlined_call_operand.hbm [shape: f32[2,1024], index: 5, kind: output, shape index: {0}]   ;;  %s1951_s6 = inlined_call_operand.hbm [shape: f32[1,1024], index: 6, kind: output, shape index: {1}]   ;;  %s1952_s7 = inlined_call_operand.hbm [shape: f32[1,1024], index: 7, kind: output, shape index: {2}]   ;;  %s1953_s8 = inlined_call_operand.hbm [shape: f32[1,512], index: 8, kind: output, shape index: {3}]   ;;  %s1954_s9 = inlined_call_operand.hbm [shape: f32[1,512], index: 9, kind: output, shape index: {4}]  }
   0x1   :  { %1964 = sst [smem:[#allocation34_spill]] %s1945_s0 }
   0x2   :  { %1965 = sst [smem:[#allocation35_spill]] %s1946_s1 }
   0x3   :  { %1966 = sst [smem:[#allocation36_spill]] %s1947_s2 }
   0x4   :  { %1967 = sst [smem:[#allocation37_spill]] %s1948_s3 }
   0x5   :  { %1968 = sst [smem:[#allocation38_spill]] %s1949_s4 }
   0x6   :  { %15 = vsyncpa [#allocation5], 0 }
   0x7   :  { %17 = vsyncpa [#allocation5 + $0x1], 0 }
   0x8   :  { %18 = vsyncpa [#allocation7], 0 }
   0x9   :  { %19 = vsyncpa [#allocation8], 0 }
   0xa   :  { %20 = vsyncpa [#allocation12], 0 }
   0xb   :  { %21 = vsyncpa [#allocation6], 0 }
   0xc   :  { %23 = vsyncpa [#allocation6 + $0x1], 0 }
   0xd   :  { %24 = vsyncpa [#allocation16], 0 }
   0xe   :  { %26 = vsyncpa [#allocation16 + $0x1], 0 }
   0xf   :  { %27 = vsyncpa [#allocation19], 0 }
  0x10   :  { %29 = vsyncpa [#allocation19 + $0x1], 0  ;;  %s1555_s30 = smov 0   ;;  %s1557_s10 = smov 0  }
  0x11   :  { %s1559_s11 = smov 0   ;;  %s1561_s12 = smov 0  }
  0x12   :  { %s1563_s13 = smov 0   ;;  %s1565_s14 = smov 0  }
  0x13 LB: > { %1969 = sst [smem:[#allocation28_spill]] %s1481_s10  ;;  %s1589_s18 = sadd.s32 4294967295, %s1497_s14   ;;  %s1497_s14 = sphi %s1565_s14, %s35_s14   ;;  %s1493_s13 = sphi %s1563_s13, %s1998_s13   ;;  %s1489_s12 = sphi %s1561_s12, %s1997_s12   ;;  %s1485_s11 = sphi %s1559_s11, %s1996_s11   ;;  %s1481_s10 = sphi %s1557_s10, %s1995_s10   ;;  %s1477_s30 = sphi %s1555_s30, %s1994_s30  }
  0x14   : > { %1970 = sst [smem:[#allocation29_spill]] %s1485_s11  ;;  %p1025_p0 = scmp.ge.s32.totalorder %s1497_s14, 1 }
  0x15   : > { %1971 = sst [smem:[#allocation30_spill]] %s1493_s13  ;;  %p70_p1 = scmp.eq.s32.totalorder %s1589_s18, 0 }
  0x16   : > { %s1972_s3 = sld [smem:[#allocation37_spill]]  ;;  %p300_p2 = scmp.lt.s32.totalorder %s1497_s14, 5 }
  0x17   : > { %s1974_s1 = sld [smem:[#allocation35_spill]]  ;;  %s1499_s29 = smov [#allocation11]  }
  0x18   : > { %p1594_p3 = pnand %p1025_p0, %p300_p2  ;;  %s1975_s2 = sld [smem:[#allocation36_spill]] }
  0x19   : > { %s1976_s4 = sld [smem:[#allocation38_spill]]  ;;  %s1500_s15 = smov [#allocation9]  }
  0x1a   : > { %p1084_p4 = pneg %p1594_p3  ;;  %s1501_s16 = smov [#allocation10]  }
  0x1b   : > { %s1502_s20 = smov [#allocation13]   ;;  %s47_s21 = sadd.s32 1, %s1493_s13 }
  0x1c   : > { %s332_s17 = sshll.u32 %s1972_s3, 4  ;;  %p1085_p5 = pnand %p1084_p4, %p70_p1  ;;  %s333_s17 = int_to_ptr.vmem [resolvable:$true] %s332_s17 }
  0x1d   : > { %s312_s22 = sshll.u32 %s1974_s1, 4  ;;  %s1955_s23 = sadd.s32 4294967294, %s1497_s14   ;;  %s313_s22 = int_to_ptr.hbm [resolvable:$true] %s312_s22 }
  0x1e   : > { %s322_s25 = sshll.u32 %s1975_s2, 4  ;;  %p49_p6 = scmp.ge.s32.totalorder %s47_s21, 4  ;;  %s323_s25 = int_to_ptr.vmem [resolvable:$true] %s322_s25 }
  0x1f   : > { %s342_s28 = sshll.u32 %s1976_s4, 4  ;;  %s56_s24 = sadd.s32 1, %s1485_s11  ;;  %s343_s28 = int_to_ptr.vmem [resolvable:$true] %s342_s28 }
  0x20   : > { %1093 = dma.vmem_to_smem (!%p1085_p5), %s333_s17, 16, %s1499_s29, [#allocation12]  }
  0x21   : > { %1087 = dma.hbm_to_smem (!%p1085_p5), %s313_s22, 16, %s1500_s15, [#allocation7]  }
  0x22   : > { %1090 = dma.vmem_to_smem (!%p1085_p5), %s323_s25, 16, %s1501_s16, [#allocation8]  }
  0x23   : > { %1096 = dma.vmem_to_smem (!%p1085_p5), %s343_s28, 16, %s1502_s20, [#allocation12]  }
  0x24   : > { %p63_p7 = scmp.ne.s32.totalorder %s1485_s11, %s1481_s10  ;;  %s2000_s21 = smov (%p49_p6, %s47_s21), 0 }
  0x25   : > { %1977 = sst [smem:[#allocation31_spill]] %s2000_s21  ;;  %p64_p8 = scmp.eq.s32.totalorder %s1497_s14, 0 }
  0x26   : > { %p69_p9 = scmp.ne.s32.totalorder %s1481_s10, %s1477_s30  ;;  %s53_s17 = ssub.s32 %s1493_s13, %s2000_s21 }
  0x27   : > { %p179_p10 = scmp.eq.s32.totalorder %s1589_s18, 3  ;;  %p54_p11 = scmp.eq.s32.totalorder %s53_s17, 0 }
  0x28   : > { %p1626_p12 = por %p70_p1, %p69_p9  ;;  %p185_p0 = scmp.eq.s32.totalorder %s1955_s23, 3 }
  0x29   : > { %p1630_p13 = por %p179_p10, %p63_p7  ;;  %p65_p2 = por %p64_p8, %p63_p7 }
  0x2a   : > { %s1637_s26 = scalar_select %p54_p11, %s1485_s11, %s56_s24  }
  0x2b   : > { %p1639_p4 = por %p185_p0, %p69_p9  ;;  %s353_s28 = sand.u32 1, %s1485_s11  }
  0x2c   : > { %1980 = sst [smem:[#allocation32_spill]] %s1637_s26  ;;  %s1054_s29 = sshll.u32 %s1493_s13, 2 }
  0x2d   : > { %s1981_s27 = scalar_select %p1639_p4, 1, 0 }
  0x2e   : > { %p1121_p5 = scmp.lt.s32.totalorder %s1497_s14, 4  ;;  %s1031_s15 = sshll.u32 %s353_s28, 2 }
  0x2f   : > { %1982 = sst [smem:[#allocation33_spill]] %s1981_s27  ;;  %s357_s2 = scalar_lea.vmem [#allocation4], %s1031_s15 }
  0x30   : > { %s1983_s0 = sld [smem:[#allocation34_spill]]  ;;  %s367_s3 = sshll.u32 %s357_s2, 4  ;;  %s368_s3 = int_to_ptr.vmem [resolvable:$true] %s367_s3 }
  0x31   : > { %p1098_p6 = pnand %p1121_p5, %p65_p2  ;;  %s354_s24 = scalar_lea.sflag [#allocation5], %s353_s28 }
  0x32   : > { %s1652_s23 = sand.u32 (!%p1594_p3), 1, %s1481_s10  }
  0x33   : > { %s1956_s16 = sshll.u32 (!%p1594_p3), %s1652_s23, 2 }
  0x34   : > { %376 = sbr.rel (%p1594_p3) target bundleno = 265 (0x109), region = 40  ;;  %s382_s15 = scalar_lea.vmem (!%p1594_p3), [#allocation4], %s1956_s16 }
  0x36   : > { %s363_s17 = scalar_lea.hbm %s1983_s0, %s1054_s29  ;;  %s379_s29 = scalar_lea.sflag (!%p1594_p3), [#allocation5], %s1652_s23 }
  0x37   : > { %s365_s1 = sshll.u32 %s363_s17, 4  ;;  %s366_s1 = int_to_ptr.hbm [resolvable:$true] %s365_s1 }
  0x38   : > { %1100 = dma.hbm_to_vmem [thread:$0]  (!%p1098_p6), %s366_s1, 64, %s368_s3, %s354_s24  }
  0x39   : > { %1448 = dma.done.wait (%p1626_p12), %s379_s29, 64  }
  0x3a   : > { %1450 = vsyncadd (%p1626_p12), %s379_s29, 4294967232 }
  0x3b   : > { %1452 = dma.done.wait (%p70_p1), [#allocation7], 16  }
  0x3c   : > { %1454 = vsyncadd (%p70_p1), [#allocation7], 4294967280 }
  0x3d   : > { %1456 = dma.done.wait (%p70_p1), [#allocation8], 16  }
  0x3e   : > { %1458 = vsyncadd (%p70_p1), [#allocation8], 4294967280 }
  0x3f   : > { %1460 = dma.done.wait (%p70_p1), [#allocation12], 32  }
  0x40   : > { %1462 = vsyncadd (%p70_p1), [#allocation12], 4294967264 }
  0x41   : > { %408 = sfence }
  0x42   : > { %v465_v0 = vld [vmem:[%s382_s15] sm:$0xf]  ;;  %v630_v1 = vlaneseq  ;;  %v1503_v2 = vmov 2.0   ;;  %v1504_v4 = vmov 0.0   ;;  %vm472_vm1 = vcmask 1041408   ;;  %s548_s1 = sld [smem:[#allocation10 + %s1489_s12]] }
  0x43   : > { %467 = vst [vmem:[#allocation1] ss:$4 sm:$0xff] %v465_v0  ;;  %1181 = vrcp.f32 %v1503_v2  ;;  %vm627_vm3 = vcmask 1040384   ;;  %s1728_s2 = sld [smem:[#allocation9 + %s1489_s12]]  ;;  %s1957_s19 = sshll.u32 %s1652_s23, 1 }
  0x44   : > { %vm1674_vm0 = vcmp.lt.s32.totalorder %v630_v1, 256  ;;  %s1740_s3 = sld [smem:[#allocation11 + %s1489_s12]]  ;;  %s1050_s22 = sshll.u32 %s1489_s12, 1 }
  0x45   : > { %645 = vst.msk [vmem:[#allocation2] sm:$0x3] %vm1674_vm0, %v1504_v4  ;;  %s1749_s28 = sld [smem:[#allocation13 + %s1489_s12]]  ;;  %s736_s24 = scalar_lea.hbm %s1951_s6, %s1050_s22 }
  0x46   : > { %646 = vst.msk [vmem:[#allocation3] sm:$0x3] %vm1674_vm0, %v1504_v4  ;;  %s1771_s15 = scalar_lea.vmem [#allocation15], %s1957_s19  ;;  %s751_s29 = scalar_lea.hbm %s1952_s7, %s1050_s22 }
  0x47   : > { %s764_s19 = scalar_lea.hbm %s1953_s8, %s1489_s12  ;;  %s1988_s0 = sshll.u32 %s1652_s23, 1 }
  0x48   : > { %s1795_s4 = scalar_lea.vmem [#allocation17], %s1988_s0  ;;  %s1959_s16 = scalar_lea.vmem [#allocation18], %s1652_s23 }
  0x49   : > { %v1182_v5 = vpop.eup %1181  ;;  %s753_s22 = sshll.u32 %s1795_s4, 4  ;;  %s1808_s0 = sshll.u32 %s764_s19, 4  ;;  %s1811_s22 = int_to_ptr.vmem [resolvable:$true] %s753_s22  ;;  %s769_s0 = int_to_ptr.hbm [resolvable:$true] %s1808_s0 }
  0x4a   : > { %v468_v6 = vld.sshfl [vmem:[#allocation1] sm:$0xff pattern:$0x73625140]  ;;  %v469_v7 = vld.sshfl [vmem:[#allocation1 + $0x8] sm:$0xff pattern:$0x73625140]  ;;  %vm492_vm2 = vweird.f32 %v1182_v5 }
  0x4b   : > { %v473_v8 = vsel %vm472_vm1, %v468_v6, 0.0  ;;  %v480_v9 = vsel %vm472_vm1, %v469_v7, 0.0  ;;  %v488_v10 = vmul.f32 2.0, %v1182_v5  ;;  %v551_v6 = vstv %s548_s1  ;;  %s738_s1 = sshll.u32 %s1771_s15, 4  ;;  %s1990_s17 = sand.u32 1, %s1589_s18   ;;  %s1778_s1 = int_to_ptr.vmem [resolvable:$true] %s738_s1 }
  0x4c   : > { %v474_v11 = vrot.slane %v473_v8, 4  ;;  %v481_v12 = vrot.slane %v480_v9, 4  ;;  %v647_v30 = vld [vmem:[#allocation2] sm:$0x3]  ;;  %vm558_vm4 = vweird.f32 %v551_v6 }
  0x4d   : > { %v489_v13 = vsub.f32 1.0, %v488_v10  ;;  %v653_v59 = vld [vmem:[#allocation3] sm:$0x3] }
  0x4e   : > { %v475_v14 = vadd.f32 %v474_v11, %v473_v8  ;;  %v482_v15 = vadd.f32 %v481_v12, %v480_v9 }
  0x4f   : > { %v490_v16 = vmul.f32 %v1182_v5, %v489_v13 }
  0x50   : > { %v476_v17 = vrot.slane %v475_v14, 2  ;;  %v483_v18 = vrot.slane %v482_v15, 2 }
  0x51   : > { %v491_v19 = vadd.f32 %v1182_v5, %v490_v16 }
  0x52   : > { %v477_v20 = vadd.f32 %v476_v17, %v475_v14  ;;  %v484_v21 = vadd.f32 %v483_v18, %v482_v15 }
  0x53   : > { %v493_v24 = vsel %vm492_vm2, %v1182_v5, %v491_v19 }
  0x54   : > { %v478_v22 = vrot.slane %v477_v20, 1  ;;  %v485_v23 = vrot.slane %v484_v21, 1 }
  0x56   : > { %v479_v25 = vadd.f32 %v478_v22, %v477_v20  ;;  %v486_v26 = vadd.f32 %v485_v23, %v484_v21 }
  0x58   : > { %v1684_v27 = vmul.f32 %v493_v24, %v479_v25  ;;  %v1686_v28 = vmul.f32 %v493_v24, %v486_v26 }
  0x5a   : > { %v498_v29 = vrot.slane %v1686_v28, 6  ;;  %v648_v31 = vrot.slane %v1686_v28, 7 }
  0x5c   : > { %v649_v32 = vsel %vm627_vm3, %v1684_v27, %v648_v31  ;;  %v499_v33 = vsel %vm472_vm1, %v1684_v27, %v498_v29 }
  0x5d   : > { %v651_v34 = vadd.f32 %v649_v32, %v647_v30  ;;  %v1694_v35 = vsub.f32 %v465_v0, %v499_v33 }
  0x5f   : > { %652 = vst.msk [vmem:[#allocation2] sm:$0x3] %vm1674_vm0, %v651_v34  ;;  %v502_v36 = vmul.f32 %v1694_v35, %v1694_v35 }
  0x61   : > { %504 = vst [vmem:[#allocation1] ss:$4 sm:$0xff] %v502_v36 }
  0x66   : > { %v664_v37 = vld [vmem:[#allocation2] sm:$0x3] }
  0x67   : > { %v666_v38 = vperm.slane %v664_v37, 0  ;;  %v667_v39 = vperm.slane %v664_v37, 1 }
  0x68   : > { %v505_v40 = vld.sshfl [vmem:[#allocation1] sm:$0xff pattern:$0x73625140]  ;;  %v506_v41 = vld.sshfl [vmem:[#allocation1 + $0x8] sm:$0xff pattern:$0x73625140] }
  0x69   : > { %v670_v42 = vsel %vm627_vm3, %v666_v38, 0.0  ;;  %v671_v43 = vsel %vm627_vm3, %v667_v39, 0.0  ;;  %v509_v44 = vsel %vm472_vm1, %v505_v40, 0.0  ;;  %v516_v45 = vsel %vm472_vm1, %v506_v41, 0.0 }
  0x6a   : > { %v672_v46 = vadd.f32 %v671_v43, %v670_v42  ;;  %v510_v47 = vrot.slane %v509_v44, 4  ;;  %v517_v48 = vrot.slane %v516_v45, 4 }
  0x6c   : > { %673 = vadd.xlane.f32.xlu0 %v672_v46  ;;  %v511_v49 = vadd.f32 %v510_v47, %v509_v44  ;;  %v518_v50 = vadd.f32 %v517_v48, %v516_v45 }
  0x6e   : > { %v512_v51 = vrot.slane %v511_v49, 2  ;;  %v519_v52 = vrot.slane %v518_v50, 2 }
  0x70   : > { %v513_v53 = vadd.f32 %v512_v51, %v511_v49  ;;  %v520_v54 = vadd.f32 %v519_v52, %v518_v50  ;;  %v592_v50 = vstv %s1728_s2  ;;  %s740_s2 = sshll.u32 %s736_s24, 4  ;;  %s1806_s24 = sshll.u32 %s1959_s16, 4  ;;  %s1786_s2 = int_to_ptr.hbm [resolvable:$true] %s740_s2  ;;  %s767_s24 = int_to_ptr.vmem [resolvable:$true] %s1806_s24 }
  0x71   : > { %s1827_s16 = scalar_lea.sflag [#allocation16], %s1990_s17  ;;  %s1297_s13 = sshra.s32 %s1786_s2, 4  ;;  %s1298_s13 = int_to_ptr.hbm [resolvable:$true] %s1297_s13 }
  0x72   : > { %v514_v55 = vrot.slane %v513_v53, 1  ;;  %v521_v56 = vrot.slane %v520_v54, 1  ;;  %s1299_s26 = scalar_lea.hbm %s1298_s13, 2  ;;  %p1304_p8 = scmp.lt.s32.totalorder %s1298_s13, %s1951_s6 }
  0x73   : > { %p1300_p1 = scmp.ne.s32.totalorder %s1298_s13, %s1299_s26 }
  0x74   : > { %v1704_v57 = vadd.f32 %v514_v55, %v513_v53  ;;  %v1706_v58 = vadd.f32 %v521_v56, %v520_v54  ;;  %v593_v54 = vsub.f32 %v1684_v27, %v592_v50  ;;  %v594_v55 = vsub.f32 %v1686_v28, %v592_v50 }
  0x75   : > { %p1301_p3 = pnand %p1300_p1, %p1630_p13 }
  0x76   : > { %v656_v60 = vrot.slane %v1706_v58, 7  ;;  %1183 = vrsqrt.f32 %v1706_v58  ;;  %v524_v7 = vmul.f32 0.5, %v1706_v58  ;;  %v523_v9 = vmul.f32 0.5, %v1704_v57 }
  0x77   : > { %1185 = vrsqrt.f32 %v1704_v57  ;;  %vm581_vm6 = vcmp.eq.f32.partialorder %v1706_v58, inf  ;;  %vm583_vm7 = vcmp.eq.f32.partialorder %v1706_v58, 0.0  ;;  %vm569_vm9 = vcmp.eq.f32.partialorder %v1704_v57, inf  ;;  %p1302_p7 = pneg %p1301_p3 }
  0x78   : > { %v657_v61 = vsel %vm627_vm3, %v1704_v57, %v656_v60  ;;  %1187 = vrsqrt.f32 %v551_v6  ;;  %v1720_v10 = vadd.f32 1e-05, %v524_v7  ;;  %v525_v14 = vadd.f32 1e-05, %v523_v9 }
  0x79   : > { %v659_v62 = vadd.f32 %v657_v61, %v653_v59  ;;  %v572_v41 = vand.u32 2147483648, %v1704_v57  ;;  %vm571_vm10 = vcmp.eq.f32.partialorder %v1704_v57, 0.0  ;;  %v584_v48 = vand.u32 2147483648, %v1706_v58 }
  0x7a   : > { %1189 = vrsqrt.f32 %v1720_v10  ;;  %vm543_vm11 = vweird.f32 %v1720_v10  ;;  %vm533_vm13 = vweird.f32 %v525_v14 }
  0x7b   : > { %660 = vst.msk [vmem:[#allocation3] sm:$0x3] %vm1674_vm0, %v659_v62  ;;  %1191 = vrsqrt.f32 %v525_v14  ;;  %v603_v62 = vstv %s1740_s3  ;;  %s1055_s3 = sshll.u32 %s1489_s12, 2 }
  0x7c   : > { %v1184_v8 = vpop.eup %1183  ;;  %s1801_s21 = scalar_lea.hbm %s1950_s5, %s1055_s3 }
  0x7d   : > { %v575_v11 = vmul.f32 %v1184_v8, %v1706_v58  ;;  %v1186_v12 = vpop.eup %1185  ;;  %s725_s20 = sshll.u32 %s1801_s21, 4  ;;  %s1873_s20 = int_to_ptr.hbm [resolvable:$true] %s725_s20 }
  0x7e   : > { %v1188_v13 = vpop.eup %1187  ;;  %v563_v15 = vmul.f32 %v1186_v12, %v1704_v57 }
  0x7f   : > { %v576_v16 = vmul.f32 %v1184_v8, %v575_v11  ;;  %v553_v17 = vmul.f32 %v1188_v13, %v551_v6  ;;  %vm559_vm5 = vweird.f32 %v1188_v13 }
  0x80   : > { %v564_v18 = vmul.f32 %v1186_v12, %v563_v15  ;;  %v1725_v24 = vpop.eup %1189  ;;  %vm560_vm8 = vmor %vm558_vm4, %vm559_vm5 }
  0x81   : > { %v577_v19 = vmul.f32 0.5, %v576_v16  ;;  %v554_v20 = vmul.f32 %v1188_v13, %v553_v17  ;;  %v538_v29 = vmul.f32 %v1725_v24, %v1720_v10  ;;  %v1192_v31 = vpop.eup %1191  ;;  %vm544_vm12 = vweird.f32 %v1725_v24 }
  0x82   : > { %v676_v63 = vld [vmem:[#allocation3] sm:$0x3]  ;;  %v565_v21 = vmul.f32 0.5, %v564_v18  ;;  %v528_v34 = vmul.f32 %v1192_v31, %v525_v14  ;;  %vm534_vm14 = vweird.f32 %v1192_v31  ;;  %vm1764_vm15 = vmor %vm543_vm11, %vm544_vm12 }
  0x83   : > { %v678_v0 = vperm.slane %v676_v63, 0  ;;  %v679_v1 = vperm.slane %v676_v63, 1  ;;  %v578_v22 = vsub.f32 1.5, %v577_v19  ;;  %v555_v23 = vmul.f32 0.5, %v554_v20  ;;  %vm535_vm2 = vmor %vm533_vm13, %vm534_vm14 }
  0x84   : > { %v566_v25 = vsub.f32 1.5, %v565_v21  ;;  %v539_v36 = vmul.f32 %v1725_v24, %v538_v29  ;;  %v529_v39 = vmul.f32 %v1192_v31, %v528_v34 }
  0x85   : > { %v682_v2 = vsel %vm627_vm3, %v678_v0, 0.0  ;;  %v683_v4 = vsel %vm627_vm3, %v679_v1, 0.0  ;;  %v579_v26 = vmul.f32 %v1184_v8, %v578_v22  ;;  %v556_v30 = vsub.f32 1.5, %v555_v23 }
  0x86   : > { %v684_v5 = vadd.f32 %v683_v4, %v682_v2  ;;  %v567_v32 = vmul.f32 %v1186_v12, %v566_v25  ;;  %v540_v40 = vmul.f32 0.5, %v539_v36  ;;  %v530_v45 = vmul.f32 0.5, %v529_v39 }
  0x87   : > { %v580_v33 = vmul.f32 %v579_v26, %v1706_v58  ;;  %v557_v37 = vmul.f32 %v1188_v13, %v556_v30 }
  0x88   : > { %685 = vadd.xlane.f32.xlu0 %v684_v5  ;;  %v568_v38 = vmul.f32 %v567_v32, %v1704_v57  ;;  %v541_v46 = vsub.f32 1.5, %v540_v40  ;;  %v531_v51 = vsub.f32 1.5, %v530_v45  ;;  %v608_v5 = vstv %s1749_s28  ;;  %s755_s28 = sshll.u32 %s751_s29, 4  ;;  %s1989_s29 = sshll.u32 %s1652_s23, 2  ;;  %s1813_s28 = int_to_ptr.hbm [resolvable:$true] %s755_s28 }
  0x89   : > { %v561_v42 = vsel %vm560_vm8, %v1188_v13, %v557_v37  ;;  %v582_v44 = vsel %vm581_vm6, %v1706_v58, %v580_v33  ;;  %s1820_s3 = scalar_lea.vmem [#allocation14], %s1989_s29  ;;  %s1303_s29 = scalar_lea.hbm %s1951_s6, 8 }
  0x8a   : > { %v570_v43 = vsel %vm569_vm9, %v1704_v57, %v568_v38  ;;  %v585_v52 = vsel %vm583_vm7, %v584_v48, %v582_v44  ;;  %v532_v56 = vmul.f32 %v1192_v31, %v531_v51  ;;  %v542_v57 = vmul.f32 %v1725_v24, %v541_v46  ;;  %s723_s19 = sshll.u32 %s1820_s3, 4  ;;  %p1305_p9 = scmp.lt.s32.totalorder %s1303_s29, %s1299_s26  ;;  %s1869_s19 = int_to_ptr.vmem [resolvable:$true] %s723_s19 }
  0x8b   : > { %v573_v47 = vsel %vm571_vm10, %v572_v41, %v570_v43  ;;  %v587_v58 = vmul.f32 %v585_v52, %v561_v42  ;;  %v595_v27 = vmul.f32 %v593_v54, %v561_v42  ;;  %v596_v28 = vmul.f32 %v594_v55, %v561_v42 }
  0x8c   : > { %v586_v49 = vmul.f32 %v573_v47, %v561_v42  ;;  %v536_v61 = vsel %vm535_vm2, %v1192_v31, %v532_v56  ;;  %v546_v2 = vsel %vm1764_vm15, %v1725_v24, %v542_v57  ;;  %p1306_p10 = por %p1305_p9, %p1304_p8 }
  0x8d   : > { %v589_v63 = vmax.f32 %v587_v58, 0.33333334  ;;  %v1043_v0 = vclamps-f32 %v595_v27, 5.0  ;;  %v1044_v1 = vclamps-f32 %v596_v28, 5.0 }
  0x8e   : > { %v588_v53 = vmax.f32 %v586_v49, 0.33333334  ;;  %p1307_p11 = pnand %p1306_p10, %p1302_p7 }
  0x8f   : > { %v591_v6 = vmin.f32 %v589_v63, 3.0  ;;  %v606_v7 = vmul.f32 %v1043_v0, %v603_v62  ;;  %v607_v8 = vmul.f32 %v1044_v1, %v603_v62  ;;  %v637_v16 = vrot.slane %v1044_v1, 7 }
  0x90   : > { %v590_v60 = vmin.f32 %v588_v53, 3.0 }
  0x91   : > { %v602_v9 = vmul.f32 %v591_v6, %v546_v2  ;;  %v610_v10 = vadd.f32 %v608_v5, %v607_v8  ;;  %v626_v11 = vrot.slane %v591_v6, 7  ;;  %v609_v14 = vadd.f32 %v608_v5, %v606_v7 }
  0x92   : > { %v601_v4 = vmul.f32 %v590_v60, %v536_v61  ;;  %v638_v19 = vsel %vm627_vm3, %v1043_v0, %v637_v16 }
  0x93   : > { %v605_v13 = vmul.f32 %v603_v62, %v602_v9  ;;  %v619_v15 = vrot.slane %v610_v10, 6  ;;  %v628_v17 = vsel %vm627_vm3, %v590_v60, %v626_v11 }
  0x94   : > { %v604_v12 = vmul.f32 %v603_v62, %v601_v4  ;;  %634 = vst.msk [vmem:[%s1771_s15] sm:$0x3] %vm1674_vm0, %v628_v17 }
  0x95   : > { %v613_v18 = vrot.slane %v605_v13, 6 }
  0x96   : > { %1310 = shalt.err (!%p1307_p11)
}
  0x97   : > { %1075 = dma.vmem_to_hbm [thread:$0]  (%p1630_p13), %s1778_s1, 32, %s1786_s2, %s1827_s16   ;;  %640 = vst.msk [vmem:[%s1795_s4] sm:$0x3] %vm1674_vm0, %v638_v19  ;;  %v614_v21 = vsel %vm472_vm1, %v604_v12, %v613_v18  ;;  %v620_v22 = vsel %vm472_vm1, %v609_v14, %v619_v15 }
  0x98   : > { %s1325_s10 = sshra.s32 %s1813_s28, 4  ;;  %s1331_s27 = scalar_lea.hbm %s1952_s7, 8  ;;  %s1326_s10 = int_to_ptr.hbm [resolvable:$true] %s1325_s10 }
  0x99   : > { %s1327_s11 = scalar_lea.hbm %s1326_s10, 2  ;;  %p1332_p5 = scmp.lt.s32.totalorder %s1326_s10, %s1952_s7 }
  0x9a   : > { %p1328_p12 = scmp.ne.s32.totalorder %s1326_s10, %s1327_s11  ;;  %p1333_p6 = scmp.lt.s32.totalorder %s1331_s27, %s1327_s11 }
  0x9c   : > { %p1329_p0 = pnand %p1328_p12, %p1630_p13  ;;  %p1334_p1 = por %p1333_p6, %p1332_p5 }
  0x9e   : > { %p1330_p2 = pneg %p1329_p0 }
  0xa0   : > { %p1335_p3 = pnand %p1334_p1, %p1330_p2 }
  0xdf   : > { %v674_v20 = vpop.xlane.xlu0 %673 }
  0xe0   : > { %1338 = shalt.err (!%p1335_p3)
}
  0xe1   : > { %1076 = dma.vmem_to_hbm [thread:$0]  (%p1630_p13), %s1811_s22, 32, %s1813_s28, %s1827_s16   ;;  %v675_v3 = vmul.f32 0.00390625, %v674_v20  ;;  %v616_v23 = vmul.f32 %v614_v21, %v1694_v35 }
  0xe2   : > { %s1991_s4 = scalar_lea.vmem [#allocation18], %s1652_s23  ;;  %s1877_s15 = scalar_lea.sflag [#allocation19], %s1990_s17 }
  0xe3   : > { %688 = vst [vmem:[%s1991_s4] sm:$0x1] %v675_v3  ;;  %v622_v24 = vadd.f32 %v620_v22, %v616_v23  ;;  %s1353_s29 = sshra.s32 %s769_s0, 4  ;;  %s1359_s10 = scalar_lea.hbm %s1953_s8, 4  ;;  %s1354_s29 = int_to_ptr.hbm [resolvable:$true] %s1353_s29 }
  0xe4   : > { %s1355_s22 = scalar_lea.hbm %s1354_s29, 1  ;;  %p1360_p10 = scmp.lt.s32.totalorder %s1354_s29, %s1953_s8 }
  0xe5   : > { %p1356_p7 = scmp.ne.s32.totalorder %s1354_s29, %s1355_s22  ;;  %p1361_p11 = scmp.lt.s32.totalorder %s1359_s10, %s1355_s22 }
  0xe7   : > { %p1357_p8 = pnand %p1356_p7, %p1630_p13  ;;  %p1362_p12 = por %p1361_p11, %p1360_p10 }
  0xe9   : > { %p1358_p9 = pneg %p1357_p8 }
  0xeb   : > { %p1363_p0 = pnand %p1362_p12, %p1358_p9 }
  0xed   : > { %1366 = shalt.err (!%p1363_p0)
}
  0xee   : > { %1077 = dma.vmem_to_hbm [thread:$0]  (%p1630_p13), %s767_s24, 16, %s769_s0, %s1877_s15   ;;  %623 = vst [vmem:[%s1820_s3] sm:$0xf] %v622_v24 }
  0xef   : > { %s691_s18 = scalar_lea.sflag [#allocation6], %s1652_s23  ;;  %s1381_s21 = sshra.s32 %s1873_s20, 4  ;;  %s1382_s21 = int_to_ptr.hbm [resolvable:$true] %s1381_s21 }
  0xf0   : > { %s1383_s26 = scalar_lea.hbm %s1382_s21, 4  ;;  %s1387_s2 = scalar_lea.hbm %s1950_s5, 16 }
  0xf1   : > { %p1384_p2 = scmp.ne.s32.totalorder %s1382_s21, %s1383_s26  ;;  %p1388_p1 = scmp.lt.s32.totalorder %s1382_s21, %s1950_s5 }
  0xf2   : > { %p1389_p3 = scmp.lt.s32.totalorder %s1387_s2, %s1383_s26 }
  0xf3   : > { %p1385_p5 = pnand %p1384_p2, %p1630_p13 }
  0xf4   : > { %p1390_p7 = por %p1389_p3, %p1388_p1 }
  0xf5   : > { %p1386_p6 = pneg %p1385_p5 }
  0xf7   : > { %p1391_p8 = pnand %p1390_p7, %p1386_p6 }
  0xf9   : > { %1394 = shalt.err (!%p1391_p8)
}
  0xfa   : > { %1074 = dma.vmem_to_hbm [thread:$0]  (%p1630_p13), %s1869_s19, 64, %s1873_s20, %s691_s18  }
  0xfb   : > { %s777_s3 = scalar_lea.hbm %s1954_s9, %s1489_s12  ;;  %s456_s29 = scalar_lea.vmem [#allocation20], %s1652_s23  ;;  %v686_v35 = vpop.xlane.xlu0 %685 }
  0xfc   : > { %s779_s22 = sshll.u32 %s456_s29, 4  ;;  %s781_s28 = sshll.u32 %s777_s3, 4  ;;  %v687_v25 = vmul.f32 0.00390625, %v686_v35  ;;  %s780_s22 = int_to_ptr.vmem [resolvable:$true] %s779_s22  ;;  %s782_s28 = int_to_ptr.hbm [resolvable:$true] %s781_s28 }
  0xfd   : > { %s1409_s16 = sshra.s32 %s782_s28, 4  ;;  %s1415_s11 = scalar_lea.hbm %s1954_s9, 4  ;;  %s1410_s16 = int_to_ptr.hbm [resolvable:$true] %s1409_s16 }
  0xfe   : > { %689 = vst [vmem:[%s456_s29] sm:$0x1] %v687_v25  ;;  %s1411_s10 = scalar_lea.hbm %s1410_s16, 1  ;;  %p1416_p12 = scmp.lt.s32.totalorder %s1410_s16, %s1954_s9 }
  0xff   : > { %p1412_p9 = scmp.ne.s32.totalorder %s1410_s16, %s1411_s10  ;;  %p1417_p0 = scmp.lt.s32.totalorder %s1415_s11, %s1411_s10 }
 0x101   : > { %p1413_p10 = pnand %p1412_p9, %p1630_p13  ;;  %p1418_p2 = por %p1417_p0, %p1416_p12 }
 0x103   : > { %p1414_p11 = pneg %p1413_p10 }
 0x105   : > { %p1419_p5 = pnand %p1418_p2, %p1414_p11 }
 0x107   : > { %1422 = shalt.err (!%p1419_p5)
}
 0x108   : > { %1078 = dma.vmem_to_hbm [thread:$0]  (%p1630_p13), %s780_s22, 16, %s782_s28, %s1877_s15  }
 0x109 PF: > { %p1126_p6 = scmp.ge.s32.totalorder %s1497_s14, 2  ;;  %s793_s18 = sand.u32 1, %s1477_s30  }
 0x10a   : > { %s794_s21 = scalar_lea.sflag [#allocation6], %s793_s18 }
 0x10b   : > { %p1102_p1 = pnand %p1126_p6, %p1639_p4 }
 0x10d   : > { %p1103_p3 = pneg %p1102_p1 }
 0x10f   : > { %1464 = dma.done.wait (%p1103_p3), %s794_s21, 64  }
 0x110   : > { %1466 = vsyncadd (%p1103_p3), %s794_s21, 4294967232  ;;  %s1993_s26 = sadd.s32 4294967294, %s1497_s14  }
 0x111   : > { %s803_s27 = sand.u32 1, %s1993_s26  }
 0x112   : > { %s804_s1 = scalar_lea.sflag [#allocation16], %s803_s27 }
 0x113   : > { %1468 = dma.done.wait (%p1103_p3), %s804_s1, 64  }
 0x114   : > { %1470 = vsyncadd (%p1103_p3), %s804_s1, 4294967232  ;;  %s824_s25 = scalar_lea.sflag [#allocation19], %s803_s27 }
 0x115   : > { %1472 = dma.done.wait (%p1103_p3), %s824_s25, 32  }
 0x116   : > { %1474 = vsyncadd (%p1103_p3), %s824_s25, 4294967264  ;;  %s35_s14 = sadd.s32 1, %s1497_s14   ;;  %s1994_s30 = sld [smem:[#allocation28_spill]] }
 0x117   : > { %p32_p13 = scmp.ge.s32.totalorder %s35_s14, 6   ;;  %s1995_s10 = sld [smem:[#allocation29_spill]] }
 0x118   : > { %s1996_s11 = sld [smem:[#allocation32_spill]] }
 0x119   : > { %s1997_s12 = sld [smem:[#allocation30_spill]]  ;;  %34 = sbr.rel (!%p32_p13) target bundleno = 19 (0x13), region = 175 }
 0x11a   : > { %s1998_s13 = sld [smem:[#allocation31_spill]] }
 0x11e   :  { %838 = vsyncpa [#allocation5], 1 }
 0x11f   :  { %840 = vsyncpa [#allocation5 + $0x1], 1 }
 0x120   :  { %841 = vsyncpa [#allocation6], 1 }
 0x121   :  { %843 = vsyncpa [#allocation6 + $0x1], 1 }
 0x122   :  { %844 = vsyncpa [#allocation16], 1 }
 0x123   :  { %846 = vsyncpa [#allocation16 + $0x1], 1 }
 0x124   :  { %847 = vsyncpa [#allocation19], 1 }
 0x125   :  { %849 = vsyncpa [#allocation19 + $0x1], 1 }
 0x126   :  { %850 = vsyncpa [#allocation7], 1 }
 0x127   :  { %852 = vsyncpa [#allocation7 + $0x1], 1 }
 0x128   :  { %853 = vsyncpa [#allocation8], 1 }
 0x129   :  { %855 = vsyncpa [#allocation8 + $0x1], 1 }
 0x12a   :  { %856 = vsyncpa [#allocation12], 1 }

</bundles_post_ra>
